<compile_context>
chip_gen: v7x
topology: tpu7x:2x2x1
jax: 0.10.0
libtpu: 0.0.40
codegen_flags: <defaults>
</compile_context>

<pallas_src>
import functools
import math

import jax
import jax.numpy as jnp
from jax.experimental import pallas as pl
from jax.experimental.pallas import tpu as pltpu

NEG_INF = -1e9
LN_EPS = 1e-5  # torch.nn.LayerNorm default


# ---------------------------------------------------------------------------
# generation-aware sizing
# ---------------------------------------------------------------------------

def _vmem_capacity_bytes():
    try:
        return int(pltpu.get_tpu_info().vmem_capacity_bytes)
    except Exception:
        return 128 * 1024 * 1024


_VMEM_CAP = _vmem_capacity_bytes()
_BIG_VMEM = _VMEM_CAP >= 100 * 1024 * 1024          # v5e/v6e: 128 MiB, v7x: 64 MiB
VMEM_LIMIT = min(int(_VMEM_CAP * 3 // 4), 96 * 1024 * 1024)

ROW_T = 512 if _BIG_VMEM else 256                   # residual-row (sublane) tile target
TN_T = 2048 if _BIG_VMEM else 1024                  # projection output-lane tile target
TF_T = 1024 if _BIG_VMEM else 512                   # FFN hidden-lane tile target
TV_T = 2048                                         # lm_head vocab tile target
TK_ENC = 512                                        # cross-attn encoder-KV tile target


def _row_tile(m, target=ROW_T):
    """Sublane (row) tile: multiple of 8 dividing m."""
    if m <= 8 or m % 8 != 0:
        return m
    t = min(target, m)
    t = max(8, t - t % 8)
    while t >= 8:
        if m % t == 0:
            return t
        t -= 8
    return m


def _lane_tile(n, target):
    """Lane (last-dim) tile: multiple of 128 dividing n, else the full dim."""
    if n <= 128 or n % 128 != 0:
        return n
    t = min(target, n)
    t -= t % 128
    while t >= 128:
        if n % t == 0:
            return t
        t -= 128
    return n


def _cparams(*semantics):
    return pltpu.CompilerParams(dimension_semantics=semantics,
                                vmem_limit_bytes=VMEM_LIMIT)


# ---------------------------------------------------------------------------
# in-kernel helpers
# ---------------------------------------------------------------------------

def _layernorm_f32(x, g, b):
    mu = jnp.mean(x, axis=-1, keepdims=True)
    xc = x - mu
    var = jnp.mean(xc * xc, axis=-1, keepdims=True)
    return xc * jax.lax.rsqrt(var + LN_EPS) * g + b


# ---------------------------------------------------------------------------
# Pallas kernels
# ---------------------------------------------------------------------------

def _ln_kernel(x_ref, g_ref, b_ref, o_ref):
    x = x_ref[...].astype(jnp.float32)
    o_ref[...] = _layernorm_f32(x, g_ref[...], b_ref[...]).astype(o_ref.dtype)


def _ln_matmul_bias_kernel(x_ref, g_ref, be_ref, w_ref, bias_ref, o_ref, h_ref):
    # grid = (row tiles, N tiles); LN hoisted: computed once per row tile (j==0)
    # into a bf16 VMEM scratch and reused for every output tile.
    j = pl.program_id(1)

    @pl.when(j == 0)
    def _():
        x = x_ref[...].astype(jnp.float32)
        h_ref[...] = _layernorm_f32(x, g_ref[...], be_ref[...]).astype(jnp.bfloat16)

    acc = jnp.dot(h_ref[...], w_ref[...], preferred_element_type=jnp.float32)
    o_ref[...] = (acc + bias_ref[...]).astype(o_ref.dtype)


def _matmul_bias_kernel(x_ref, w_ref, bias_ref, o_ref):
    acc = jnp.dot(x_ref[...].astype(jnp.bfloat16), w_ref[...],
                  preferred_element_type=jnp.float32)
    o_ref[...] = (acc + bias_ref[...]).astype(o_ref.dtype)


def _self_attn_kernel(q_ref, k_ref, v_ref, padb_ref, ow_ref, ob_ref, res_ref,
                      o_ref, acc_ref, *, scale):
    # grid = (batch, head); the head axis is the out-projection reduction.
    # q/k/v blocks are head-major [1, 1, S, dh] bf16 (no lane slicing).
    h = pl.program_id(1)

    @pl.when(h == 0)
    def _():
        acc_ref[...] = jnp.zeros_like(acc_ref)

    q = q_ref[0, 0]                        # [S, dh] bf16
    k = k_ref[0, 0]
    v = v_ref[0, 0]
    s = jax.lax.dot_general(q, k, (((1,), (1,)), ((), ())),
                            preferred_element_type=jnp.float32) * scale   # [S, S] f32
    sq = s.shape[0]
    qi = jax.lax.broadcasted_iota(jnp.int32, (sq, sq), 0)
    ki = jax.lax.broadcasted_iota(jnp.int32, (sq, sq), 1)
    s = jnp.where(ki <= qi, s, NEG_INF) + padb_ref[0]                     # causal + pad
    s = s - jnp.max(s, axis=-1, keepdims=True)
    p = jnp.exp(s)
    p = p * pl.reciprocal(jnp.sum(p, axis=-1, keepdims=True), approx=True)
    o_h = jnp.dot(p.astype(jnp.bfloat16), v,
                  preferred_element_type=jnp.float32)                     # [S, dh] f32
    # fused output projection: accumulate o_h @ o_w[h] over heads.
    acc_ref[...] += jnp.dot(o_h.astype(jnp.bfloat16), ow_ref[0],
                            preferred_element_type=jnp.float32)[None]

    @pl.when(h == pl.num_programs(1) - 1)
    def _():
        o_ref[...] = (acc_ref[...] + ob_ref[...]
                      + res_ref[...].astype(jnp.float32)).astype(o_ref.dtype)


def _cross_attn_kernel(q_ref, k_ref, v_ref, ow_ref, ob_ref, res_ref, o_ref,
                       acc_ref, m_ref, l_ref, po_ref, *, scale):
    # grid = (batch, head, enc-KV tiles); flash-style online softmax over the
    # encoder axis, out-projection accumulated over the head axis.
    h = pl.program_id(1)
    kk = pl.program_id(2)
    nk = pl.num_programs(2)

    @pl.when(jnp.logical_and(h == 0, kk == 0))
    def _():
        acc_ref[...] = jnp.zeros_like(acc_ref)

    @pl.when(kk == 0)
    def _():
        m_ref[...] = jnp.full(m_ref.shape, -jnp.inf, jnp.float32)
        l_ref[...] = jnp.zeros(l_ref.shape, jnp.float32)
        po_ref[...] = jnp.zeros(po_ref.shape, jnp.float32)

    q = q_ref[0, 0]                        # [S, dh]  bf16
    k = k_ref[0, 0]                        # [tk, dh] bf16
    v = v_ref[0, 0]
    s = jax.lax.dot_general(q, k, (((1,), (1,)), ((), ())),
                            preferred_element_type=jnp.float32) * scale   # [S, tk] f32
    m_new = jnp.maximum(m_ref[...], jnp.max(s, axis=-1, keepdims=True))
    alpha = jnp.exp(m_ref[...] - m_new)
    p = jnp.exp(s - m_new)
    l_ref[...] = alpha * l_ref[...] + jnp.sum(p, axis=-1, keepdims=True)
    po_ref[...] = alpha * po_ref[...] + jnp.dot(p.astype(jnp.bfloat16), v,
                                                preferred_element_type=jnp.float32)
    m_ref[...] = m_new

    @pl.when(kk == nk - 1)
    def _():
        o_h = po_ref[...] * pl.reciprocal(l_ref[...], approx=True)        # [S, dh]
        acc_ref[...] += jnp.dot(o_h.astype(jnp.bfloat16), ow_ref[0],
                                preferred_element_type=jnp.float32)[None]

    @pl.when(jnp.logical_and(h == pl.num_programs(1) - 1, kk == nk - 1))
    def _():
        o_ref[...] = (acc_ref[...] + ob_ref[...]
                      + res_ref[...].astype(jnp.float32)).astype(o_ref.dtype)


def _ln_ffn_residual_kernel(x_ref, g_ref, be_ref, w1_ref, b1_ref, w2_ref, b2_ref,
                            o_ref, acc_ref, h_ref):
    # grid = (row tiles, F tiles); F is the reduction axis (last, "arbitrary").
    # LN hoisted into a bf16 scratch at j==0 (not recomputed per F tile).
    j = pl.program_id(1)

    @pl.when(j == 0)
    def _():
        acc_ref[...] = jnp.zeros_like(acc_ref)
        x = x_ref[...].astype(jnp.float32)
        h_ref[...] = _layernorm_f32(x, g_ref[...], be_ref[...]).astype(jnp.bfloat16)

    h1 = jnp.dot(h_ref[...], w1_ref[...],
                 preferred_element_type=jnp.float32) + b1_ref[...]
    h1 = jax.nn.gelu(h1, approximate=False)          # exact erf GELU (PyTorch default)
    acc_ref[...] += jnp.dot(h1.astype(jnp.bfloat16), w2_ref[...],
                            preferred_element_type=jnp.float32)

    @pl.when(j == pl.num_programs(1) - 1)
    def _():
        o_ref[...] = (acc_ref[...] + b2_ref[...]
                      + x_ref[...].astype(jnp.float32)).astype(o_ref.dtype)


def _ln_lmhead_kernel(x_ref, g_ref, be_ref, e_ref, o_ref, h_ref):
    # Final LayerNorm fused with the tied lm_head (contracts over D against
    # embed_tokens rows directly); LN hoisted across vocab tiles via scratch.
    j = pl.program_id(1)

    @pl.when(j == 0)
    def _():
        x = x_ref[...].astype(jnp.float32)
        h_ref[...] = _layernorm_f32(x, g_ref[...], be_ref[...]).astype(jnp.bfloat16)

    o_ref[...] = jax.lax.dot_general(
        h_ref[...], e_ref[...], (((1,), (1,)), ((), ())),
        preferred_element_type=jnp.float32).astype(o_ref.dtype)


# ---------------------------------------------------------------------------
# Pallas wrappers
# ---------------------------------------------------------------------------

def layernorm(x, g, b, out_dtype=jnp.bfloat16):
    M, D = x.shape
    tm = _row_tile(M)
    return pl.pallas_call(
        _ln_kernel,
        out_shape=jax.ShapeDtypeStruct((M, D), out_dtype),
        grid=(M // tm,),
        in_specs=[pl.BlockSpec((tm, D), lambda i: (i, 0)),
                  pl.BlockSpec((1, D), lambda i: (0, 0)),
                  pl.BlockSpec((1, D), lambda i: (0, 0))],
        out_specs=pl.BlockSpec((tm, D), lambda i: (i, 0)),
        compiler_params=_cparams("parallel"),
    )(x, g.reshape(1, D), b.reshape(1, D))


def ln_matmul_bias(x, g, b, w, bias, out_dtype=jnp.bfloat16):
    M, D = x.shape
    N = w.shape[1]
    tm = _row_tile(M)
    tn = _lane_tile(N, TN_T)
    return pl.pallas_call(
        _ln_matmul_bias_kernel,
        out_shape=jax.ShapeDtypeStruct((M, N), out_dtype),
        grid=(M // tm, N // tn),
        in_specs=[pl.BlockSpec((tm, D), lambda i, j: (i, 0)),
                  pl.BlockSpec((1, D), lambda i, j: (0, 0)),
                  pl.BlockSpec((1, D), lambda i, j: (0, 0)),
                  pl.BlockSpec((D, tn), lambda i, j: (0, j)),
                  pl.BlockSpec((1, tn), lambda i, j: (0, j))],
        out_specs=pl.BlockSpec((tm, tn), lambda i, j: (i, j)),
        scratch_shapes=[pltpu.VMEM((tm, D), jnp.bfloat16)],
        compiler_params=_cparams("parallel", "arbitrary"),
    )(x, g.reshape(1, D), b.reshape(1, D), w, bias.reshape(1, N))


def matmul_bias(x, w, bias, out_dtype=jnp.bfloat16):
    M, K = x.shape
    N = w.shape[1]
    tm = _row_tile(M)
    tn = _lane_tile(N, TN_T)
    return pl.pallas_call(
        _matmul_bias_kernel,
        out_shape=jax.ShapeDtypeStruct((M, N), out_dtype),
        grid=(M // tm, N // tn),
        in_specs=[pl.BlockSpec((tm, K), lambda i, j: (i, 0)),
                  pl.BlockSpec((K, tn), lambda i, j: (0, j)),
                  pl.BlockSpec((1, tn), lambda i, j: (0, j))],
        out_specs=pl.BlockSpec((tm, tn), lambda i, j: (i, j)),
        compiler_params=_cparams("parallel", "parallel"),
    )(x, w, bias.reshape(1, N))


def self_attention(q, k, v, pad_bias, o_w3, o_b, residual, scale):
    # q/k/v: [B, H, S, dh] bf16; out-projection + residual fused, head axis reduced.
    B, H, S, Dh = q.shape
    D = H * Dh
    kernel = functools.partial(_self_attn_kernel, scale=scale)
    return pl.pallas_call(
        kernel,
        out_shape=jax.ShapeDtypeStruct((B, S, D), jnp.bfloat16),
        grid=(B, H),
        in_specs=[pl.BlockSpec((1, 1, S, Dh), lambda b, h: (b, h, 0, 0)),
                  pl.BlockSpec((1, 1, S, Dh), lambda b, h: (b, h, 0, 0)),
                  pl.BlockSpec((1, 1, S, Dh), lambda b, h: (b, h, 0, 0)),
                  pl.BlockSpec((1, 1, S), lambda b, h: (b, 0, 0)),
                  pl.BlockSpec((1, Dh, D), lambda b, h: (h, 0, 0)),
                  pl.BlockSpec((1, 1, D), lambda b, h: (0, 0, 0)),
                  pl.BlockSpec((1, S, D), lambda b, h: (b, 0, 0))],
        out_specs=pl.BlockSpec((1, S, D), lambda b, h: (b, 0, 0)),
        scratch_shapes=[pltpu.VMEM((1, S, D), jnp.float32)],
        compiler_params=_cparams("parallel", "arbitrary"),
    )(q, k, v, pad_bias, o_w3, o_b, residual)


def cross_attention(q, k, v, o_w3, o_b, residual, scale):
    # q: [B, H, S, dh]; k/v: [B, H, Senc, dh]; encoder axis tiled flash-style.
    B, H, S, Dh = q.shape
    Sk = k.shape[2]
    D = H * Dh
    tk = _row_tile(Sk, TK_ENC)
    kernel = functools.partial(_cross_attn_kernel, scale=scale)
    return pl.pallas_call(
        kernel,
        out_shape=jax.ShapeDtypeStruct((B, S, D), jnp.bfloat16),
        grid=(B, H, Sk // tk),
        in_specs=[pl.BlockSpec((1, 1, S, Dh), lambda b, h, kk: (b, h, 0, 0)),
                  pl.BlockSpec((1, 1, tk, Dh), lambda b, h, kk: (b, h, kk, 0)),
                  pl.BlockSpec((1, 1, tk, Dh), lambda b, h, kk: (b, h, kk, 0)),
                  pl.BlockSpec((1, Dh, D), lambda b, h, kk: (h, 0, 0)),
                  pl.BlockSpec((1, 1, D), lambda b, h, kk: (0, 0, 0)),
                  pl.BlockSpec((1, S, D), lambda b, h, kk: (b, 0, 0))],
        out_specs=pl.BlockSpec((1, S, D), lambda b, h, kk: (b, 0, 0)),
        scratch_shapes=[pltpu.VMEM((1, S, D), jnp.float32),
                        pltpu.VMEM((S, 1), jnp.float32),
                        pltpu.VMEM((S, 1), jnp.float32),
                        pltpu.VMEM((S, Dh), jnp.float32)],
        compiler_params=_cparams("parallel", "arbitrary", "arbitrary"),
    )(q, k, v, o_w3, o_b, residual)


def ln_ffn_residual(x, g, b, w1, b1, w2, b2):
    M, D = x.shape
    F = w1.shape[1]
    tm = _row_tile(M)
    tf = _lane_tile(F, TF_T)
    return pl.pallas_call(
        _ln_ffn_residual_kernel,
        out_shape=jax.ShapeDtypeStruct((M, D), jnp.bfloat16),
        grid=(M // tm, F // tf),
        in_specs=[pl.BlockSpec((tm, D), lambda i, j: (i, 0)),
                  pl.BlockSpec((1, D), lambda i, j: (0, 0)),
                  pl.BlockSpec((1, D), lambda i, j: (0, 0)),
                  pl.BlockSpec((D, tf), lambda i, j: (0, j)),
                  pl.BlockSpec((1, tf), lambda i, j: (0, j)),
                  pl.BlockSpec((tf, D), lambda i, j: (j, 0)),
                  pl.BlockSpec((1, D), lambda i, j: (0, 0))],
        out_specs=pl.BlockSpec((tm, D), lambda i, j: (i, 0)),
        scratch_shapes=[pltpu.VMEM((tm, D), jnp.float32),
                        pltpu.VMEM((tm, D), jnp.bfloat16)],
        compiler_params=_cparams("parallel", "arbitrary"),
    )(x, g.reshape(1, D), b.reshape(1, D), w1, b1.reshape(1, F), w2,
      b2.reshape(1, D))


def ln_lmhead(x, g, b, emb_bf16):
    M, D = x.shape
    V = emb_bf16.shape[0]
    # pad vocab to a 128 multiple so large vocabularies never force a single block
    Vp = V if (V <= 128 or V % 128 == 0) else ((V + 127) // 128) * 128
    if Vp != V:
        emb_bf16 = jnp.pad(emb_bf16, ((0, Vp - V), (0, 0)))
    tm = _row_tile(M)
    tv = _lane_tile(Vp, TV_T)
    out = pl.pallas_call(
        _ln_lmhead_kernel,
        out_shape=jax.ShapeDtypeStruct((M, Vp), jnp.float32),
        grid=(M // tm, Vp // tv),
        in_specs=[pl.BlockSpec((tm, D), lambda i, j: (i, 0)),
                  pl.BlockSpec((1, D), lambda i, j: (0, 0)),
                  pl.BlockSpec((1, D), lambda i, j: (0, 0)),
                  pl.BlockSpec((tv, D), lambda i, j: (j, 0))],
        out_specs=pl.BlockSpec((tm, tv), lambda i, j: (i, j)),
        scratch_shapes=[pltpu.VMEM((tm, D), jnp.bfloat16)],
        compiler_params=_cparams("parallel", "arbitrary"),
    )(x, g.reshape(1, D), b.reshape(1, D), emb_bf16)
    return out[:, :V] if Vp != V else out


# ---------------------------------------------------------------------------
# Parameter init (deterministic, synthetic; matmul weights stored in bf16)
# ---------------------------------------------------------------------------

def init_params(key, vocab, d_model, n_heads, d_ffn, n_layers, max_pos, pad_id):
    std = 0.02
    dh = d_model // n_heads
    keys = iter(jax.random.split(key, 4 + n_layers * 8))

    def nrm(shape, dtype=jnp.float32):
        return (std * jax.random.normal(next(keys), shape)).astype(dtype)

    embed_tokens = nrm((vocab, d_model))
    embed_tokens = embed_tokens.at[pad_id].set(0.0)            # padding_idx row zeroed
    embed_positions = nrm((max_pos + 2, d_model))              # MBart pos-emb, offset 2

    def ln():
        return jnp.ones((d_model,), jnp.float32), jnp.zeros((d_model,), jnp.float32)

    layers = []
    for _ in range(n_layers):
        lp = {
            # fused q/k/v and cross k/v projections; columns laid out [3|2, H, dh]
            "sa_qkv_w": nrm((d_model, 3 * d_model), jnp.bfloat16),
            "sa_qkv_b": jnp.zeros((3 * d_model,), jnp.float32),
            # out-projection stored head-major [H, dh, D] for the fused attn kernel
            "sa_o_w": nrm((n_heads, dh, d_model), jnp.bfloat16),
            "sa_o_b": jnp.zeros((1, 1, d_model), jnp.float32),
            "xa_q_w": nrm((d_model, d_model), jnp.bfloat16),
            "xa_q_b": jnp.zeros((d_model,), jnp.float32),
            "xa_kv_w": nrm((d_model, 2 * d_model), jnp.bfloat16),
            "xa_kv_b": jnp.zeros((2 * d_model,), jnp.float32),
            "xa_o_w": nrm((n_heads, dh, d_model), jnp.bfloat16),
            "xa_o_b": jnp.zeros((1, 1, d_model), jnp.float32),
            "fc1_w": nrm((d_model, d_ffn), jnp.bfloat16),
            "fc1_b": jnp.zeros((d_ffn,), jnp.float32),
            "fc2_w": nrm((d_ffn, d_model), jnp.bfloat16),
            "fc2_b": jnp.zeros((d_model,), jnp.float32),
        }
        lp["ln_sa_g"], lp["ln_sa_b"] = ln()
        lp["ln_xa_g"], lp["ln_xa_b"] = ln()
        lp["ln_ffn_g"], lp["ln_ffn_b"] = ln()
        layers.append(lp)

    ln_emb_g, ln_emb_b = ln()
    ln_fin_g, ln_fin_b = ln()
    return dict(embed_tokens=embed_tokens, embed_positions=embed_positions,
                layers=layers, ln_emb_g=ln_emb_g, ln_emb_b=ln_emb_b,
                ln_fin_g=ln_fin_g, ln_fin_b=ln_fin_b, n_heads=n_heads)


# ---------------------------------------------------------------------------
# Forward (equivalent of BARTDecoder.forward with labels=None, no cache)
# ---------------------------------------------------------------------------

def bart_decoder_forward(params, input_ids, encoder_hidden_states, attention_mask):
    B, S = input_ids.shape
    E = params["embed_tokens"]
    V, D = E.shape
    H = params["n_heads"]
    Dh = D // H
    scale = 1.0 / math.sqrt(Dh)
    Senc = encoder_hidden_states.shape[1]
    E_bf16 = E.astype(jnp.bfloat16)

    # --- embedding (gather = XLA glue), scale_embedding=True, offset-2 pos emb ---
    x = jnp.take(E, input_ids, axis=0) * math.sqrt(D)                   # [B, S, D] f32
    x = x + params["embed_positions"][2:2 + S][None]
    x = layernorm(x.reshape(B * S, D), params["ln_emb_g"], params["ln_emb_b"])
    # residual stream is carried in bf16 (LN statistics upcast to f32 in-kernel)

    # per-batch additive key-padding bias (causal mask is built inside the kernel)
    pad_bias = jnp.where(attention_mask > 0, 0.0, NEG_INF).astype(jnp.float32)
    pad_bias = pad_bias.reshape(B, 1, S)

    enc2d = encoder_hidden_states.reshape(B * Senc, D).astype(jnp.bfloat16)

    for lp in params["layers"]:
        # ---- self attention: LN + fused QKV -> attn (bf16 MXU) + fused out-proj ----
        qkv = ln_matmul_bias(x, lp["ln_sa_g"], lp["ln_sa_b"],
                             lp["sa_qkv_w"], lp["sa_qkv_b"])             # [B*S, 3D] bf16
        qkv = qkv.reshape(B, S, 3, H, Dh).transpose(2, 0, 3, 1, 4)       # [3, B, H, S, dh]
        x = self_attention(qkv[0], qkv[1], qkv[2], pad_bias,
                           lp["sa_o_w"], lp["sa_o_b"],
                           x.reshape(B, S, D), scale).reshape(B * S, D)

        # ---- cross attention: LN + Q, fused enc K/V, flash over Senc, fused out-proj ----
        q = ln_matmul_bias(x, lp["ln_xa_g"], lp["ln_xa_b"],
                           lp["xa_q_w"], lp["xa_q_b"])                   # [B*S, D] bf16
        q = q.reshape(B, S, H, Dh).transpose(0, 2, 1, 3)                 # [B, H, S, dh]
        kv = matmul_bias(enc2d, lp["xa_kv_w"], lp["xa_kv_b"])            # [B*Senc, 2D] bf16
        kv = kv.reshape(B, Senc, 2, H, Dh).transpose(2, 0, 3, 1, 4)      # [2, B, H, Senc, dh]
        x = cross_attention(q, kv[0], kv[1], lp["xa_o_w"], lp["xa_o_b"],
                            x.reshape(B, S, D), scale).reshape(B * S, D)

        # ---- feed-forward: LN (hoisted) + fc1 + gelu + fc2 + residual, F-tiled ----
        x = ln_ffn_residual(x, lp["ln_ffn_g"], lp["ln_ffn_b"],
                            lp["fc1_w"], lp["fc1_b"], lp["fc2_w"], lp["fc2_b"])

    # ---- final LayerNorm fused with tied lm_head (vocab-tiled, no bias) ----
    logits = ln_lmhead(x, params["ln_fin_g"], params["ln_fin_b"], E_bf16)
    return logits.reshape(B, S, V)


# ---------------------------------------------------------------------------
# Main
# ---------------------------------------------------------------------------

if __name__ == "__main__":
    B, S = 2, 8           # batch, decoder sequence length
    D, H, F = 32, 4, 64   # hidden, heads, ffn
    V = 64                # vocab size
    Senc = 16             # encoder sequence length
    L = 2                 # decoder layers
    MAX_POS = 16
    PAD_ID = 1

    key = jax.random.PRNGKey(0)
    k_par, k_ids, k_enc = jax.random.split(key, 3)

    params = init_params(k_par, V, D, H, F, L, MAX_POS, PAD_ID)

    input_ids = jax.random.randint(k_ids, (B, S), 2, V).astype(jnp.int32)
    input_ids = input_ids.at[1, -2:].set(PAD_ID)                        # some padding
    attention_mask = (input_ids != PAD_ID).astype(jnp.int32)            # prepare_inputs_for_inference
    encoder_hidden_states = jax.random.normal(k_enc, (B, Senc, D), jnp.float32)

    logits = bart_decoder_forward(params, input_ids, encoder_hidden_states, attention_mask)
    logits = jax.block_until_ready(logits)

    assert logits.shape == (B, S, V), logits.shape
    assert bool(jnp.all(jnp.isfinite(logits)))
    print("KERNEL_OK")
</pallas_src>

<mosaic_0001>
module attributes {stable_mosaic.version = 11 : i64} {
  func.func @_ln_kernel(%arg0: i32, %arg1: memref<16x32xf32, #tpu.memory_space<vmem>>, %arg2: memref<1x32xf32, #tpu.memory_space<vmem>>, %arg3: memref<1x32xf32, #tpu.memory_space<vmem>>, %arg4: memref<16x32xbf16, #tpu.memory_space<vmem>>) attributes {dimension_semantics = [#tpu.dimension_semantics<parallel>], iteration_bounds = array<i64: 1>, scalar_prefetch = 0 : i64, scratch_operands = 0 : i64, tpu.core_type = #tpu.core_type<tc>, window_params = [{transform_indices = @transform_0, window_bounds = array<i64: 16, 32>}, {pipeline_mode = #tpu.pipeline_mode<synchronous>, transform_indices = @transform_1, window_bounds = array<i64: 1, 32>}, {pipeline_mode = #tpu.pipeline_mode<synchronous>, transform_indices = @transform_2, window_bounds = array<i64: 1, 32>}, {transform_indices = @transform_3, window_bounds = array<i64: 16, 32>}]} {
    %c0 = arith.constant 0 : index
    %c0_0 = arith.constant 0 : index
    %0 = vector.load %arg1[%c0, %c0_0] : memref<16x32xf32, #tpu.memory_space<vmem>>, vector<16x32xf32>
    %c0_1 = arith.constant 0 : index
    %c0_2 = arith.constant 0 : index
    %1 = vector.load %arg2[%c0_1, %c0_2] : memref<1x32xf32, #tpu.memory_space<vmem>>, vector<1x32xf32>
    %c0_3 = arith.constant 0 : index
    %c0_4 = arith.constant 0 : index
    %2 = vector.load %arg3[%c0_3, %c0_4] : memref<1x32xf32, #tpu.memory_space<vmem>>, vector<1x32xf32>
    %cst = arith.constant dense<0.000000e+00> : vector<16xf32>
    %3 = vector.multi_reduction <add>, %0, %cst [1] : vector<16x32xf32> to vector<16xf32>
    %4 = vector.shape_cast %3 : vector<16xf32> to vector<16x1xf32>
    %cst_5 = arith.constant 3.200000e+01 : f32
    %5 = vector.broadcast %cst_5 : f32 to vector<16x1xf32>
    %6 = arith.divf %4, %5 : vector<16x1xf32>
    %7 = vector.broadcast %6 : vector<16x1xf32> to vector<16x32xf32>
    %8 = arith.subf %0, %7 : vector<16x32xf32>
    %9 = arith.mulf %8, %8 : vector<16x32xf32>
    %cst_6 = arith.constant dense<0.000000e+00> : vector<16xf32>
    %10 = vector.multi_reduction <add>, %9, %cst_6 [1] : vector<16x32xf32> to vector<16xf32>
    %11 = vector.shape_cast %10 : vector<16xf32> to vector<16x1xf32>
    %cst_7 = arith.constant 3.200000e+01 : f32
    %12 = vector.broadcast %cst_7 : f32 to vector<16x1xf32>
    %13 = arith.divf %11, %12 : vector<16x1xf32>
    %cst_8 = arith.constant 9.99999974E-6 : f32
    %14 = vector.broadcast %cst_8 : f32 to vector<16x1xf32>
    %15 = arith.addf %13, %14 : vector<16x1xf32>
    %16 = math.rsqrt %15 : vector<16x1xf32>
    %17 = vector.broadcast %16 : vector<16x1xf32> to vector<16x32xf32>
    %18 = arith.mulf %8, %17 : vector<16x32xf32>
    %19 = vector.broadcast %1 : vector<1x32xf32> to vector<16x32xf32>
    %20 = arith.mulf %18, %19 : vector<16x32xf32>
    %21 = vector.broadcast %2 : vector<1x32xf32> to vector<16x32xf32>
    %22 = arith.addf %20, %21 : vector<16x32xf32>
    %23 = arith.truncf %22 : vector<16x32xf32> to vector<16x32xbf16>
    %c0_9 = arith.constant 0 : index
    %c0_10 = arith.constant 0 : index
    %24 = vector.load %arg4[%c0_9, %c0_10] : memref<16x32xbf16, #tpu.memory_space<vmem>>, vector<16x32xbf16>
    tpu.vector_store %arg4[%c0_9, %c0_10], %23 {strides = array<i32>} : memref<16x32xbf16, #tpu.memory_space<vmem>>, vector<16x32xbf16>,
    return
  }
  func.func @transform_0(%arg0: i32) -> (i32, i32) {
    %c0_i32 = arith.constant 0 : i32
    %c0_i32_0 = arith.constant 0 : i32
    return %arg0, %c0_i32 : i32, i32
  }
  func.func @transform_1(%arg0: i32) -> (i32, i32) {
    %c0_i32 = arith.constant 0 : i32
    %c0_i32_0 = arith.constant 0 : i32
    %c0_i32_1 = arith.constant 0 : i32
    return %c0_i32, %c0_i32_0 : i32, i32
  }
  func.func @transform_2(%arg0: i32) -> (i32, i32) {
    %c0_i32 = arith.constant 0 : i32
    %c0_i32_0 = arith.constant 0 : i32
    %c0_i32_1 = arith.constant 0 : i32
    return %c0_i32, %c0_i32_0 : i32, i32
  }
  func.func @transform_3(%arg0: i32) -> (i32, i32) {
    %c0_i32 = arith.constant 0 : i32
    %c0_i32_0 = arith.constant 0 : i32
    return %arg0, %c0_i32 : i32, i32
  }
}

</mosaic_0001>

<bundles_post_ra>
// kernel: tpu_custom_call.1
= control target key start
LH: loop header
LB: loop body
LE: loop exit
PB: predicated region body
PF: predicated region fallthrough
CT: control target
= control target key end

     0   :  { %8 = vsyncpa [#allocation3], 0  ;;  %s328_s0 = inlined_call_operand.hbm [shape: f32[16,32], index: 0, kind: input, shape index: {}]   ;;  %s329_s1 = inlined_call_operand.hbm [shape: f32[1,32], index: 1, kind: input, shape index: {}]   ;;  %s330_s2 = inlined_call_operand.hbm [shape: f32[1,32], index: 2, kind: input, shape index: {}]   ;;  %s331_s3 = inlined_call_operand.hbm [shape: bf16[16,32], index: 3, kind: output, shape index: {}]  }
   0x1   :  { %9 = vsyncpa [#allocation6], 0 }
   0x2   :  { %10 = vsyncpa [#allocation4], 0  ;;  %s241_s12 = smov [#allocation5]   ;;  %s242_s14 = smov [#allocation2]  }
   0x3   :  { %s29_s13 = sshll.u32 %s241_s12, 4  ;;  %s16_s15 = sshll.u32 %s242_s14, 4  ;;  %s30_s13 = int_to_ptr.vmem [resolvable:$true] %s29_s13  ;;  %s269_s15 = int_to_ptr.vmem [resolvable:$true] %s16_s15 }
   0x4   :  { %s147_s18 = scalar_lea.hbm %s329_s1, 16 }
   0x5   :  { %p148_p0 = scmp.ne.s32.totalorder %s329_s1, %s147_s18  ;;  %p151_p1 = scmp.lt.u32.totalorder %s147_s18, %s329_s1 }
   0x7   :  { %p153_p2 = pnand %p151_p1, %p148_p0 }
   0x9   :  { %156 = shalt.err (!%p153_p2)
}
   0xa   :  { %s157_s23 = scalar_lea.vmem %s30_s13, 16  ;;  %s161_s24 = scalar_lea.vmem %s30_s13, 32 }
   0xb   :  { %p158_p3 = scmp.ne.s32.totalorder %s30_s13, %s157_s23  ;;  %p162_p4 = scmp.lt.s32.totalorder %s30_s13, %s30_s13 }
   0xc   :  { %p163_p5 = scmp.lt.s32.totalorder %s161_s24, %s157_s23 }
   0xe   :  { %p164_p6 = por %p163_p5, %p162_p4 }
  0x10   :  { %p165_p7 = pnand %p164_p6, %p158_p3 }
  0x12   :  { %168 = shalt.err (!%p165_p7)
}
  0x13   :  { %32 = dma.hbm_to_vmem [thread:$0]  %s329_s1, 16, %s30_s13, [#allocation6]  }
  0x14   :  { %s169_s29 = scalar_lea.hbm %s328_s0, 256 }
  0x15   :  { %p170_p8 = scmp.ne.s32.totalorder %s328_s0, %s169_s29  ;;  %p173_p9 = scmp.lt.u32.totalorder %s169_s29, %s328_s0 }
  0x17   :  { %p175_p10 = pnand %p173_p9, %p170_p8 }
  0x19   :  { %178 = shalt.err (!%p175_p10)
}
  0x1a   :  { %s179_s7 = scalar_lea.vmem %s269_s15, 256  ;;  %p184_p12 = scmp.lt.s32.totalorder %s269_s15, %s269_s15 }
  0x1b   :  { %p180_p11 = scmp.ne.s32.totalorder %s269_s15, %s179_s7  ;;  %p185_p13 = scmp.lt.s32.totalorder %s179_s7, %s179_s7 }
  0x1d   :  { %p186_p0 = por %p185_p13, %p184_p12 }
  0x1f   :  { %p187_p1 = pnand %p186_p0, %p180_p11 }
  0x21   :  { %190 = shalt.err (!%p187_p1)
}
  0x22   :  { %s243_s1 = smov 128   ;;  %s244_s8 = smov 8  }
  0x23   :  { %22 = dma.hbm_to_vmem [thread:$0]  %s328_s0, 256, %s269_s15, [#allocation3], %s243_s1, %s243_s1, %s244_s8  }
  0x24   :  { %s245_s11 = smov [#allocation7]   ;;  %s191_s16 = scalar_lea.hbm %s330_s2, 16 }
  0x25   :  { %s39_s12 = sshll.u32 %s245_s11, 4  ;;  %p192_p2 = scmp.ne.s32.totalorder %s330_s2, %s191_s16  ;;  %s40_s12 = int_to_ptr.vmem [resolvable:$true] %s39_s12 }
  0x26   :  { %p195_p3 = scmp.lt.u32.totalorder %s191_s16, %s330_s2 }
  0x28   :  { %p197_p4 = pnand %p195_p3, %p192_p2 }
  0x2a   :  { %200 = shalt.err (!%p197_p4)
}
  0x2b   :  { %s201_s21 = scalar_lea.vmem %s40_s12, 16  ;;  %s205_s0 = scalar_lea.vmem %s40_s12, 32 }
  0x2c   :  { %p202_p5 = scmp.ne.s32.totalorder %s40_s12, %s201_s21  ;;  %p206_p6 = scmp.lt.s32.totalorder %s40_s12, %s40_s12 }
  0x2d   :  { %p207_p7 = scmp.lt.s32.totalorder %s205_s0, %s201_s21 }
  0x2f   :  { %p208_p8 = por %p207_p7, %p206_p6 }
  0x31   :  { %p209_p9 = pnand %p208_p8, %p202_p5 }
  0x33   :  { %212 = shalt.err (!%p209_p9)
}
  0x34   :  { %42 = dma.hbm_to_vmem [thread:$0]  %s330_s2, 16, %s40_s12, [#allocation6]  }
  0x35   :  { %235 = dma.done.wait [#allocation3], 256  }
  0x36   :  { %236 = vsyncadd [#allocation3], 4294967040 }
  0x37   :  { %237 = dma.done.wait [#allocation6], 32  }
  0x38   :  { %238 = vsyncadd [#allocation6], 4294967264  ;;  %vm56_vm0 = vcmask 261120   ;;  %v52_v0 = vld [vmem:[#allocation2] sm:$0xff]  ;;  %v53_v1 = vld [vmem:[#allocation2 + $0x8] sm:$0xff]  ;;  %vm108_vm1 = vcmask 257024  }
  0x39   :  { %v57_v2 = vsel %vm56_vm0, %v52_v0, 0.0  ;;  %v60_v3 = vsel %vm56_vm0, %v53_v1, 0.0  ;;  %v129_v21 = vld [vmem:[#allocation5] ss:$0 sm:$0xff]  ;;  %v130_v23 = vld [vmem:[#allocation7] ss:$0 sm:$0xff] }
  0x3a   :  { %58 = vadd.xlane.f32.xlu0 %v57_v2  ;;  %s246_s2 = smov [#allocation8]  }
  0x3b   :  { %s116_s23 = sshll.u32 %s246_s2, 4  ;;  %s117_s23 = int_to_ptr.vmem [resolvable:$true] %s116_s23 }
  0x3c   :  { %s213_s24 = scalar_lea.vmem %s117_s23, 128  ;;  %p218_p11 = scmp.lt.s32.totalorder %s117_s23, %s117_s23 }
  0x3d   :  { %p214_p10 = scmp.ne.s32.totalorder %s117_s23, %s213_s24  ;;  %p219_p12 = scmp.lt.s32.totalorder %s213_s24, %s213_s24 }
  0x3e   :  { %61 = vadd.xlane.f32.xlu0 %v60_v3 }
  0x3f   :  { %p220_p13 = por %p219_p12, %p218_p11 }
  0x41   :  { %p221_p0 = pnand %p220_p13, %p214_p10 }
  0xc7   :  { %v59_v4 = vpop.xlane.xlu0 %58 }
  0xc8   :  { %v64_v5 = vmul.f32 0.03125, %v59_v4 }
  0xca   :  { %v66_v6 = vsub.f32 %v52_v0, %v64_v5 }
  0xcb   :  { %v62_v7 = vpop.xlane.xlu0 %61 }
  0xcc   :  { %v65_v8 = vmul.f32 0.03125, %v62_v7  ;;  %v68_v9 = vmul.f32 %v66_v6, %v66_v6 }
  0xce   :  { %v67_v10 = vsub.f32 %v53_v1, %v65_v8  ;;  %v70_v11 = vsel %vm56_vm0, %v68_v9, 0.0 }
  0xcf   :  { %71 = vadd.xlane.f32.xlu1 %v70_v11 }
  0xd0   :  { %v69_v12 = vmul.f32 %v67_v10, %v67_v10 }
  0xd2   :  { %v73_v13 = vsel %vm56_vm0, %v69_v12, 0.0 }
  0xd3   :  { %74 = vadd.xlane.f32.xlu1 %v73_v13 }
 0x15c   :  { %v72_v14 = vpop.xlane.xlu1 %71 }
 0x15d   :  { %v76_v15 = vmul.f32 0.03125, %v72_v14 }
 0x15f   :  { %v78_v16 = vadd.f32 1e-05, %v76_v15 }
 0x160   :  { %v75_v17 = vpop.xlane.xlu1 %74 }
 0x161   :  { %143 = vrsqrt.f32 %v78_v16  ;;  %v77_v18 = vmul.f32 0.03125, %v75_v17 }
 0x163   :  { %v79_v19 = vadd.f32 1e-05, %v77_v18 }
 0x165   :  { %145 = vrsqrt.f32 %v79_v19 }
 0x16b   :  { %v144_v20 = vpop.eup %143 }
 0x16c   :  { %v82_v22 = vmul.f32 %v144_v20, %v66_v6 }
 0x16e   :  { %v90_v24 = vmul.f32 %v129_v21, %v82_v22 }
 0x16f   :  { %v146_v25 = vpop.eup %145 }
 0x170   :  { %v83_v26 = vmul.f32 %v146_v25, %v67_v10  ;;  %v98_v27 = vadd.f32 %v130_v23, %v90_v24 }
 0x172   :  { %v91_v28 = vmul.f32 %v129_v21, %v83_v26  ;;  %v133_v29 = vpack.c.bf16 %v98_v27, %v98_v27 }
 0x174   :  { %v99_v30 = vadd.f32 %v130_v23, %v91_v28  ;;  %109 = vst.msk [vmem:[#allocation8] sm:$0xf] %vm108_vm1, %v133_v29 }
 0x176   :  { %v134_v31 = vpack.c.bf16 %v99_v30, %v99_v30 }
 0x178   :  { %110 = vst.msk [vmem:[#allocation8 + $0x4] sm:$0xf] %vm108_vm1, %v134_v31 }
 0x179   :  { %224 = shalt.err (!%p221_p0)
}
 0x17a   :  { %s225_s27 = scalar_lea.hbm %s331_s3, 128 }
 0x17b   :  { %p226_p1 = scmp.ne.s32.totalorder %s331_s3, %s225_s27  ;;  %p229_p2 = scmp.lt.u32.totalorder %s225_s27, %s331_s3 }
 0x17d   :  { %p231_p3 = pnand %p229_p2, %p226_p1 }
 0x17f   :  { %234 = shalt.err (!%p231_p3)
}
 0x180   :  { %s247_s5 = smov 64   ;;  %s248_s6 = smov 4  }
 0x181   :  { %122 = dma.vmem_to_hbm [thread:$0]  %s117_s23, 128, %s331_s3, [#allocation4], %s247_s5, %s247_s5, %s248_s6  }
 0x182   :  { %239 = dma.done.wait [#allocation4], 128  }
 0x183   :  { %240 = vsyncadd [#allocation4], 4294967168 }
 0x184   :  { %126 = vsyncpa [#allocation3], 1 }
 0x185   :  { %127 = vsyncpa [#allocation6], 1 }
 0x186   :  { %128 = vsyncpa [#allocation4], 1 }

</bundles_post_ra>
